<compile_context>
chip_gen: v5e
topology: v5e:2x2
jax: 0.10.0
libtpu: 0.0.40
codegen_flags: <defaults>
</compile_context>

<pallas_src>
import functools

import jax
import jax.numpy as jnp
from jax.experimental import pallas as pl
from jax.experimental.pallas import tpu as pltpu

OUT_NUM = 4
BN_EPS = 1e-5


def _fused_conv_bn_relu_kernel(xcol_ref, w_ref, b_ref, o_ref):
    # xcol_ref: (K, TL)   im2col activations, lanes = flattened batch*length
    # w_ref:    (CO, K)   conv weights with bottleneck + BN scale folded in
    # b_ref:    (CO, 1)   folded BN bias
    # o_ref:    (CO, TL)
    y = jnp.dot(w_ref[...], xcol_ref[...], preferred_element_type=jnp.float32)
    y = y + b_ref[...]
    o_ref[...] = jnp.maximum(y, 0.0).astype(o_ref.dtype)


def inception_module(x, w_bneck, w_conv, gamma, beta, run_mean, run_var,
                     *, tile_nl=512):
    """InceptionModule forward (eval mode).

    x:        (N, ni, L) float32
    w_bneck:  (nf, ni) or None   1x1 bottleneck conv weight (no bias)
    w_conv:   (co, cin, ks)      main conv weight (cin = nf if bottleneck else ni)
    gamma/beta/run_mean/run_var: (co,) BatchNorm1d parameters / running stats
    returns:  (N, co, L) float32
    """
    N, ni, L = x.shape
    co, _, ks = w_conv.shape
    # "same" zero padding (ks//2 each side) matches PyTorch only for odd ks.
    assert ks % 2 == 1, "even kernel sizes need asymmetric padding"
    pad = ks // 2

    # ---- host-side algebra: fold BN, fuse bottleneck, flatten weights ----
    scale = gamma * jax.lax.rsqrt(run_var + BN_EPS)               # (co,)
    bias = (beta - run_mean * scale).reshape(co, 1)               # (co, 1)
    w_conv_bn = w_conv * scale[:, None, None]                     # (co, cin, ks)

    if w_bneck is not None:
        # fuse 1x1 bottleneck into the conv weights (exact; also shrinks the
        # contraction here since ni < nf).
        w_eff = jnp.einsum('ofk,fc->ock', w_conv_bn, w_bneck)     # (co, ni, ks)
    else:
        w_eff = w_conv_bn

    ci = w_eff.shape[1]
    K = ks * ci
    # row index of the im2col operand is k*ci + c  ->  weight layout (co, ks, ci)
    w_flat = jnp.transpose(w_eff, (0, 2, 1)).reshape(co, K)       # (co, K)

    # ---- host-side im2col (layout plumbing; heavy compute stays in-kernel) --
    xp = jnp.pad(x, ((0, 0), (0, 0), (pad, pad)))                 # (N, ci, L+ks-1)
    cols = jnp.stack([xp[:, :, k:k + L] for k in range(ks)], axis=1)  # (N,ks,ci,L)
    xcol = cols.reshape(N, K, L).transpose(1, 0, 2).reshape(K, N * L)  # (K, N*L)

    # ---- lane-dense tiling of the flattened batch*length axis ----
    NL = N * L
    NLp = ((NL + 127) // 128) * 128
    if NLp != NL:
        xcol = jnp.pad(xcol, ((0, 0), (0, NLp - NL)))
    tl = min(tile_nl, NLp)
    tl = max(128, (tl // 128) * 128)
    while NLp % tl:
        tl -= 128
    grid = (NLp // tl,)

    out = pl.pallas_call(
        _fused_conv_bn_relu_kernel,
        out_shape=jax.ShapeDtypeStruct((co, NLp), jnp.float32),
        grid_spec=pltpu.PrefetchScalarGridSpec(
            num_scalar_prefetch=0,
            grid=grid,
            in_specs=[
                pl.BlockSpec((K, tl), lambda i: (0, i)),     # im2col activations
                pl.BlockSpec((co, K), lambda i: (0, 0)),     # fused weights
                pl.BlockSpec((co, 1), lambda i: (0, 0)),     # fused bias
            ],
            out_specs=pl.BlockSpec((co, tl), lambda i: (0, i)),
        ),
        compiler_params=pltpu.CompilerParams(
            dimension_semantics=("parallel",)),
    )(xcol, w_flat, bias)

    # back to PyTorch NCL layout
    return out[:, :NL].reshape(co, N, L).transpose(1, 0, 2)


def _reference(x, w_bneck, w_conv, gamma, beta, run_mean, run_var):
    """Pure-JAX reference matching the PyTorch forward (eval-mode BN)."""
    co, _, ks = w_conv.shape
    pad = ks // 2
    L = x.shape[-1]
    z = jnp.einsum('fc,ncl->nfl', w_bneck, x) if w_bneck is not None else x
    zp = jnp.pad(z, ((0, 0), (0, 0), (pad, pad)))
    y = jnp.zeros((x.shape[0], co, L), jnp.float32)
    for k in range(ks):
        y = y + jnp.einsum('of,nfl->nol', w_conv[:, :, k], zp[:, :, k:k + L])
    scale = gamma * jax.lax.rsqrt(run_var + BN_EPS)
    y = (y - run_mean[None, :, None]) * scale[None, :, None] + beta[None, :, None]
    return jnp.maximum(y, 0.0)


if __name__ == "__main__":
    # small shapes consistent with the module: ni=4, nf=8, ks=39, OUT_NUM=4
    N, ni, nf, L, ks = 2, 4, 8, 64, 39
    co = nf * OUT_NUM

    key = jax.random.PRNGKey(0)
    kx, kb, kc, kg, kbt, km, kv = jax.random.split(key, 7)

    x = jax.random.normal(kx, (N, ni, L), dtype=jnp.float32)
    w_bneck = jax.random.normal(kb, (nf, ni), dtype=jnp.float32) * 0.3
    w_conv = jax.random.normal(kc, (co, nf, ks), dtype=jnp.float32) * 0.1
    gamma = 1.0 + 0.1 * jax.random.normal(kg, (co,), dtype=jnp.float32)
    beta = 0.1 * jax.random.normal(kbt, (co,), dtype=jnp.float32)
    run_mean = 0.1 * jax.random.normal(km, (co,), dtype=jnp.float32)
    run_var = 1.0 + 0.1 * jax.random.uniform(kv, (co,), dtype=jnp.float32)

    out = inception_module(x, w_bneck, w_conv, gamma, beta, run_mean, run_var)
    out = jax.block_until_ready(out)

    ref = _reference(x, w_bneck, w_conv, gamma, beta, run_mean, run_var)
    assert out.shape == (N, co, L)
    assert jnp.allclose(out, ref, atol=1e-4, rtol=1e-4), \
        f"max err {jnp.max(jnp.abs(out - ref))}"

    print("KERNEL_OK")
</pallas_src>

<mosaic_0001>
module attributes {stable_mosaic.version = 11 : i64} {
  func.func @_fused_conv_bn_relu_kernel(%arg0: i32, %arg1: memref<156x128xf32, #tpu.memory_space<vmem>>, %arg2: memref<32x156xf32, #tpu.memory_space<vmem>>, %arg3: memref<32x1xf32, #tpu.memory_space<vmem>>, %arg4: memref<32x128xf32, #tpu.memory_space<vmem>>) attributes {dimension_semantics = [#tpu.dimension_semantics<parallel>], iteration_bounds = array<i64: 1>, scalar_prefetch = 0 : i64, scratch_operands = 0 : i64, tpu.core_type = #tpu.core_type<tc>, window_params = [{transform_indices = @transform_0, window_bounds = array<i64: 156, 128>}, {pipeline_mode = #tpu.pipeline_mode<synchronous>, transform_indices = @transform_1, window_bounds = array<i64: 32, 156>}, {pipeline_mode = #tpu.pipeline_mode<synchronous>, transform_indices = @transform_2, window_bounds = array<i64: 32, 1>}, {transform_indices = @transform_3, window_bounds = array<i64: 32, 128>}]} {
    %c0 = arith.constant 0 : index
    %c0_0 = arith.constant 0 : index
    %0 = vector.load %arg2[%c0, %c0_0] : memref<32x156xf32, #tpu.memory_space<vmem>>, vector<32x156xf32>
    %c0_1 = arith.constant 0 : index
    %c0_2 = arith.constant 0 : index
    %1 = vector.load %arg1[%c0_1, %c0_2] : memref<156x128xf32, #tpu.memory_space<vmem>>, vector<156x128xf32>
    %cst = arith.constant dense<0.000000e+00> : vector<32x128xf32>
    %2 = tpu.matmul %0, %1, %cst {dimension_numbers = #tpu.dot_dimension_numbers<[1], [0], [0], [1], [0, 0, 1, 1], [], []>} : vector<32x156xf32>, vector<156x128xf32>, vector<32x128xf32> -> vector<32x128xf32>
    %c0_3 = arith.constant 0 : index
    %c0_4 = arith.constant 0 : index
    %3 = vector.load %arg3[%c0_3, %c0_4] : memref<32x1xf32, #tpu.memory_space<vmem>>, vector<32x1xf32>
    %4 = vector.broadcast %3 : vector<32x1xf32> to vector<32x128xf32>
    %5 = arith.addf %2, %4 : vector<32x128xf32>
    %cst_5 = arith.constant 0.000000e+00 : f32
    %6 = vector.broadcast %cst_5 : f32 to vector<32x128xf32>
    %7 = arith.maximumf %5, %6 : vector<32x128xf32>
    %c0_6 = arith.constant 0 : index
    %c0_7 = arith.constant 0 : index
    %8 = vector.load %arg4[%c0_6, %c0_7] : memref<32x128xf32, #tpu.memory_space<vmem>>, vector<32x128xf32>
    tpu.vector_store %arg4[%c0_6, %c0_7], %7 {strides = array<i32>} : memref<32x128xf32, #tpu.memory_space<vmem>>, vector<32x128xf32>,
    return
  }
  func.func @transform_0(%arg0: i32) -> (i32, i32) {
    %c0_i32 = arith.constant 0 : i32
    %c0_i32_0 = arith.constant 0 : i32
    return %c0_i32, %arg0 : i32, i32
  }
  func.func @transform_1(%arg0: i32) -> (i32, i32) {
    %c0_i32 = arith.constant 0 : i32
    %c0_i32_0 = arith.constant 0 : i32
    %c0_i32_1 = arith.constant 0 : i32
    return %c0_i32, %c0_i32_0 : i32, i32
  }
  func.func @transform_2(%arg0: i32) -> (i32, i32) {
    %c0_i32 = arith.constant 0 : i32
    %c0_i32_0 = arith.constant 0 : i32
    %c0_i32_1 = arith.constant 0 : i32
    return %c0_i32, %c0_i32_0 : i32, i32
  }
  func.func @transform_3(%arg0: i32) -> (i32, i32) {
    %c0_i32 = arith.constant 0 : i32
    %c0_i32_0 = arith.constant 0 : i32
    return %c0_i32, %arg0 : i32, i32
  }
}

</mosaic_0001>

<bundles_post_ra>
// kernel: tpu_custom_call.1
= control target key start
LH: loop header
LB: loop body
LE: loop exit
PB: predicated region body
PF: predicated region fallthrough
CT: control target
= control target key end

     0   :  { %8 = vsyncpa [#allocation3], 0  ;;  %s386_s0 = inlined_call_operand.hbm [shape: f32[156,128], index: 0, kind: input, shape index: {}]   ;;  %s387_s1 = inlined_call_operand.hbm [shape: f32[32,156], index: 1, kind: input, shape index: {}]   ;;  %s388_s2 = inlined_call_operand.vmem [shape: f32[32,1], index: 2, kind: input, shape index: {}]   ;;  %s389_s3 = inlined_call_operand.hbm [shape: f32[32,128], index: 3, kind: output, shape index: {}]  }
   0x1   :  { %9 = vsyncpa [#allocation6], 0 }
   0x2   :  { %10 = vsyncpa [#allocation4], 0  ;;  %s15_s14 = sshll.u32 %s386_s0, 4  ;;  %s327_s15 = smov [#allocation2]   ;;  %s16_s14 = int_to_ptr.hbm [resolvable:$true] %s15_s14 }
   0x3   :  { %s17_s16 = sshll.u32 %s327_s15, 4  ;;  %s28_s19 = sshll.u32 %s387_s1, 4  ;;  %s18_s16 = int_to_ptr.vmem [resolvable:$true] %s17_s16  ;;  %s29_s19 = int_to_ptr.hbm [resolvable:$true] %s28_s19 }
   0x4   :  { %s328_s20 = smov 128   ;;  %s329_s21 = smov 8  }
   0x5   :  { %23 = dma.hbm_to_vmem [thread:$0]  %s16_s14, 2560, %s18_s16, [#allocation3], %s328_s20, %s328_s20, %s329_s21  }
   0x6   :  { %s330_s22 = smov [#allocation5]   ;;  %s331_s24 = smov 256  }
   0x7   :  { %s30_s23 = sshll.u32 %s330_s22, 4  ;;  %s332_s0 = smov 16   ;;  %s31_s23 = int_to_ptr.vmem [resolvable:$true] %s30_s23 }
   0x8   :  { %36 = dma.hbm_to_vmem [thread:$0]  %s29_s19, 1024, %s31_s23, [#allocation6], %s331_s24, %s331_s24, %s332_s0  }
   0x9   :  { %321 = dma.done.wait [#allocation3], 2560  }
   0xa   :  { %322 = vsyncadd [#allocation3], 4294964736 }
   0xb   :  { %323 = dma.done.wait [#allocation6], 1024  }
   0xc   :  { %324 = vsyncadd [#allocation6], 4294966272  ;;  %v70_v0 = vld [vmem:[#allocation2 + $0x78] sm:$0xff]  ;;  %v69_v1 = vld [vmem:[#allocation2 + $0x70] sm:$0xff]  ;;  %vm112_vm0 = vcmask 1043456   ;;  %v333_v3 = vmov 0  }
   0xd   :  { %116 = vmatpush.msra.mxu0 %v70_v0  ;;  %207 = vmatpush.msra.mxu2 %v70_v0  ;;  %v68_v2 = vld [vmem:[#allocation2 + $0x68] sm:$0xff]  ;;  %v74_v4 = vld [vmem:[#allocation2 + $0x98] sm:$0xf]  ;;  %v73_v5 = vld [vmem:[#allocation2 + $0x90] sm:$0xff]  ;;  %vm99_vm1 = vcmask 228352   ;;  %s188_s8 = sshll.u32 %s389_s3, 4  ;;  %s189_s8 = int_to_ptr.hbm [resolvable:$true] %s188_s8 }
   0xe   :  { %208 = vmatpush.msra.mxu3 %v70_v0  ;;  %248 = vset.pattern.permute.xlu1 %v333_v3  ;;  %v67_v6 = vld [vmem:[#allocation2 + $0x60] sm:$0xff]  ;;  %v72_v7 = vld [vmem:[#allocation2 + $0x88] sm:$0xff]  ;;  %v66_v8 = vld [vmem:[#allocation2 + $0x58] sm:$0xff] }
   0xf   :  { %117 = vmatpush.msra.mxu0 %v69_v1  ;;  %209 = vmatpush.msra.mxu2 %v69_v1  ;;  %v71_v9 = vld [vmem:[#allocation2 + $0x80] sm:$0xff]  ;;  %v65_v10 = vld [vmem:[#allocation2 + $0x50] sm:$0xff]  ;;  %v48_v11 = vld [vmem:[#allocation5 + $0x8] sm:$0xff] }
  0x10   :  { %210 = vmatpush.msra.mxu3 %v69_v1  ;;  %202 = vmatpush.msk.msra.mxu1 %vm112_vm0, %v74_v4  ;;  %v64_v12 = vld [vmem:[#allocation2 + $0x48] sm:$0xff]  ;;  %v63_v13 = vld [vmem:[#allocation2 + $0x40] sm:$0xff]  ;;  %v77_v14 = vld [vmem:[%s388_s2 + $0x10] sm:$0xff] }
  0x11   :  { %118 = vmatpush.msra.mxu0 %v68_v2  ;;  %211 = vmatpush.msra.mxu2 %v68_v2  ;;  %v62_v15 = vld [vmem:[#allocation2 + $0x38] sm:$0xff]  ;;  %v75_v16 = vld [vmem:[%s388_s2] sm:$0xff]  ;;  %v61_v17 = vld [vmem:[#allocation2 + $0x30] sm:$0xff] }
  0x12   :  { %212 = vmatpush.msra.mxu3 %v68_v2  ;;  %158 = vmatpush.msra.mxu1 %v73_v5  ;;  %v50_v18 = vld [vmem:[#allocation5 + $0x18] sm:$0xff]  ;;  %v60_v19 = vld [vmem:[#allocation2 + $0x28] sm:$0xff]  ;;  %v59_v20 = vld [vmem:[#allocation2 + $0x20] sm:$0xff] }
  0x13   :  { %119 = vmatpush.msra.mxu0 %v67_v6  ;;  %213 = vmatpush.msra.mxu2 %v67_v6  ;;  %v78_v21 = vld [vmem:[%s388_s2 + $0x18] sm:$0xff]  ;;  %v76_v23 = vld [vmem:[%s388_s2 + $0x8] sm:$0xff]  ;;  %v57_v24 = vld [vmem:[#allocation2 + $0x10] sm:$0xff]  ;;  %s334_s2 = smov [#allocation7]  }
  0x14   :  { %214 = vmatpush.msra.mxu3 %v67_v6  ;;  %159 = vmatpush.msra.mxu1 %v72_v7  ;;  %v58_v22 = vld [vmem:[#allocation2 + $0x18] sm:$0xff]  ;;  %v52_v25 = vld [vmem:[#allocation5 + $0x28] sm:$0xff]  ;;  %v55_v27 = vld [vmem:[#allocation2] sm:$0xff]  ;;  %s186_s5 = sshll.u32 %s334_s2, 4  ;;  %s187_s5 = int_to_ptr.vmem [resolvable:$true] %s186_s5 }
  0x15   :  { %120 = vmatpush.msra.mxu0 %v66_v8  ;;  %215 = vmatpush.msra.mxu2 %v66_v8  ;;  %v56_v26 = vld [vmem:[#allocation2 + $0x8] sm:$0xff]  ;;  %v47_v28 = vld [vmem:[#allocation5] sm:$0xff]  ;;  %v49_v29 = vld [vmem:[#allocation5 + $0x10] sm:$0xff] }
  0x16   :  { %216 = vmatpush.msra.mxu3 %v66_v8  ;;  %160 = vmatpush.msra.mxu1 %v71_v9  ;;  %v51_v30 = vld [vmem:[#allocation5 + $0x20] sm:$0xff]  ;;  %v54_v31 = vld [vmem:[#allocation5 + $0x38] sm:$0xff]  ;;  %v53_v32 = vld [vmem:[#allocation5 + $0x30] sm:$0xff] }
  0x17   :  { %121 = vmatpush.msra.mxu0 %v65_v10  ;;  %217 = vmatpush.msra.mxu2 %v65_v10 }
  0x18   :  { %218 = vmatpush.msra.mxu3 %v65_v10  ;;  %203 = vmatmul.msk.f32.vlgmr.msra.gmra.mxu1 %vm99_vm1, %v48_v11 }
  0x19   :  { %122 = vmatpush.msra.mxu0 %v64_v12  ;;  %219 = vmatpush.msra.mxu2 %v64_v12 }
  0x1a   :  { %220 = vmatpush.msra.mxu3 %v64_v12  ;;  %247 = vset.pattern.permute.xlu0 %v333_v3 }
  0x1b   :  { %123 = vmatpush.msra.mxu0 %v63_v13  ;;  %221 = vmatpush.msra.mxu2 %v63_v13 }
  0x1c   :  { %222 = vmatpush.msra.mxu3 %v63_v13  ;;  %91 = vperm.xlu1 %248, %v77_v14  }
  0x1d   :  { %124 = vmatpush.msra.mxu0 %v62_v15  ;;  %223 = vmatpush.msra.mxu2 %v62_v15 }
  0x1e   :  { %224 = vmatpush.msra.mxu3 %v62_v15  ;;  %81 = vperm.xlu0 %247, %v75_v16  }
  0x1f   :  { %125 = vmatpush.msra.mxu0 %v61_v17  ;;  %225 = vmatpush.msra.mxu2 %v61_v17 }
  0x20   :  { %226 = vmatpush.msra.mxu3 %v61_v17  ;;  %204 = vmatmul.msk.f32.gmra.mxu1 %vm99_vm1, %v50_v18 }
  0x21   :  { %126 = vmatpush.msra.mxu0 %v60_v19  ;;  %227 = vmatpush.msra.mxu2 %v60_v19 }
  0x22   :  { %228 = vmatpush.msra.mxu3 %v60_v19 }
  0x23   :  { %127 = vmatpush.msra.mxu0 %v59_v20  ;;  %229 = vmatpush.msra.mxu2 %v59_v20 }
  0x24   :  { %230 = vmatpush.msra.mxu3 %v59_v20  ;;  %96 = vperm.xlu1 %248, %v78_v21  }
  0x25   :  { %128 = vmatpush.msra.mxu0 %v58_v22  ;;  %231 = vmatpush.msra.mxu2 %v58_v22 }
  0x26   :  { %232 = vmatpush.msra.mxu3 %v58_v22  ;;  %86 = vperm.xlu0 %247, %v76_v23  }
  0x27   :  { %129 = vmatpush.msra.mxu0 %v57_v24  ;;  %233 = vmatpush.msra.mxu2 %v57_v24 }
  0x28   :  { %234 = vmatpush.msra.mxu3 %v57_v24  ;;  %205 = vmatmul.msk.f32.gmra.mxu1 %vm99_vm1, %v52_v25 }
  0x29   :  { %130 = vmatpush.msra.mxu0 %v56_v26  ;;  %235 = vmatpush.msra.mxu2 %v56_v26 }
  0x2a   :  { %236 = vmatpush.msra.mxu3 %v56_v26 }
  0x2b   :  { %131 = vmatpush.msra.mxu0 %v55_v27  ;;  %237 = vmatpush.msra.mxu2 %v55_v27 }
  0x2c   :  { %238 = vmatpush.msra.mxu3 %v55_v27  ;;  %132 = vmatmul.f32.vlgmr.msra.gmra.mxu0 %v47_v28 }
  0x2d   :  { %135 = vmatmul.f32.vlgmr.msra.gmra.mxu2 %v49_v29  ;;  %138 = vmatmul.f32.vlgmr.msra.gmra.mxu3 %v51_v30 }
  0x30   :  { %206 = vmatmul.msk.f32.gmra.mxu1 %vm99_vm1, %v54_v31 }
  0x35   :  { %141 = vmatmul.f32.gmra.mxu3 %v53_v32 }
  0x8e   :  { %v92_v39 = vpop.permute.xlu1 %91 }
  0x90   :  { %v82_v34 = vpop.permute.xlu0 %81 }
  0x95   :  { %v162_v33 = vpop.f32.mrf.mxu1 }
  0x96   :  { %v97_v51 = vpop.permute.xlu1 %96 }
  0x98   :  { %v87_v41 = vpop.permute.xlu0 %86 }
  0x9d   :  { %v165_v35 = vpop.f32.mrf.mxu1 }
  0xa5   :  { %v168_v42 = vpop.f32.mrf.mxu1 }
  0xa9   :  { %v133_v36 = vpop.f32.mrf.mxu0 }
  0xaa   :  { %v134_v37 = vadd.f32 %v133_v36, %v82_v34 }
  0xac   :  { %v163_v38 = vadd.f32 %v162_v33, %v134_v37 }
  0xad   :  { %v171_v53 = vpop.f32.mrf.mxu1 }
  0xae   :  { %v174_v40 = vmax.f32 %v163_v38, 0.0 }
  0xb0   :  { %178 = vst [vmem:[#allocation7] sm:$0xff] %v174_v40  ;;  %v136_v43 = vpop.f32.mrf.mxu2  ;;  %v139_v44 = vpop.f32.mrf.mxu3 }
  0xb1   :  { %v137_v45 = vadd.f32 %v136_v43, %v87_v41  ;;  %v140_v46 = vadd.f32 %v139_v44, %v92_v39 }
  0xb3   :  { %v166_v47 = vadd.f32 %v165_v35, %v137_v45  ;;  %v169_v48 = vadd.f32 %v168_v42, %v140_v46 }
  0xb5   :  { %v175_v49 = vmax.f32 %v166_v47, 0.0  ;;  %v176_v50 = vmax.f32 %v169_v48, 0.0 }
  0xb7   :  { %179 = vst [vmem:[#allocation7 + $0x8] sm:$0xff] %v175_v49 }
  0xb8   :  { %180 = vst [vmem:[#allocation7 + $0x10] sm:$0xff] %v176_v50  ;;  %v142_v52 = vpop.f32.mrf.mxu3 }
  0xb9   :  { %v143_v54 = vadd.f32 %v142_v52, %v97_v51 }
  0xbb   :  { %v172_v55 = vadd.f32 %v171_v53, %v143_v54 }
  0xbd   :  { %v177_v56 = vmax.f32 %v172_v55, 0.0 }
  0xbf   :  { %181 = vst [vmem:[#allocation7 + $0x18] sm:$0xff] %v177_v56 }
  0xc0   :  { %194 = dma.vmem_to_hbm [thread:$0]  %s187_s5, 512, %s189_s8, [#allocation4], %s328_s20, %s328_s20, %s329_s21  }
  0xc1   :  { %325 = dma.done.wait [#allocation4], 512  }
  0xc2   :  { %326 = vsyncadd [#allocation4], 4294966784 }
  0xc3   :  { %199 = vsyncpa [#allocation3], 1 }
  0xc4   :  { %200 = vsyncpa [#allocation6], 1 }
  0xc5   :  { %201 = vsyncpa [#allocation4], 1 }

</bundles_post_ra>
